<compile_context>
chip_gen: v6e
topology: v6e:2x2x1
jax: 0.10.0
libtpu: 0.0.40
codegen_flags: <defaults>
</compile_context>

<pallas_src>
import functools

import jax
import jax.numpy as jnp
from jax import lax
from jax.experimental import pallas as pl
from jax.experimental.pallas import tpu as pltpu


def _round_up(x, m):
    return -(-x // m) * m


def _vmem_budget_bytes():
    """Per-generation VMEM budget (v5e/v6e: 128 MiB physical, v7x: 64 MiB)."""
    try:
        cap = int(getattr(pltpu.get_tpu_info(), "vmem_capacity_bytes"))
    except Exception:
        cap = 64 * 1024 * 1024          # conservative (v7x-sized) fallback
    # ~25% headroom for compiler-internal scratch; never request > 100 MiB.
    return min(int(cap) * 3 // 4, 100 * 1024 * 1024)


# ----------------------------------------------------------------------------
# Class-major kernel (small C): tiles are (C, TB); lanes = batch (dense).
# ----------------------------------------------------------------------------
def _osl2_cmajor_kernel(lc_ref, la_ref, trow_ref, acc_ref, g_ref, *,
                        n_valid, tile_b):
    C, TB = lc_ref.shape
    step = pl.program_id(0)

    @pl.when(step == 0)
    def _init():
        acc_ref[...] = jnp.zeros_like(acc_ref)
        g_ref[...] = jnp.zeros_like(g_ref)

    lc = lc_ref[...].astype(jnp.float32)               # (C, TB)
    la = la_ref[...].astype(jnp.float32)               # (C, TB)
    trow = trow_ref[...]                               # (1, TB) int32

    # Ragged-tail validity mask (grid = cdiv(B, tb), no host padding).
    col = lax.broadcasted_iota(jnp.int32, (1, TB), 1)
    valid = (step * tile_b + col) < n_valid            # (1, TB) bool

    # softmax over classes (sublane axis); argmax reuses the column max.
    m = jnp.max(lc, axis=0, keepdims=True)                              # (1, TB)
    row_ids = lax.broadcasted_iota(jnp.int32, (C, TB), 0)
    argmax = jnp.min(jnp.where(lc == m, row_ids, C), axis=0, keepdims=True)
    correct = (argmax == trow).astype(jnp.float32)                      # (1, TB)

    e = jnp.exp(lc - m)                                                 # (C, TB)
    denom = jnp.sum(e, axis=0, keepdims=True)                           # (1, TB)
    # correctness mask folded into the per-sample reciprocal (one (1,TB) scale);
    # exact reciprocal kept for 1e-5 parity with the reference.
    scale = correct * pl.reciprocal(denom, approx=False)                # (1, TB)
    # jnp.where (not multiply) so garbage/inf in OOB columns cannot make NaN.
    probs_m = jnp.where(valid, e * scale, 0.0)                          # (C, TB)

    # log_softmax over classes for the adversarial logits.
    ma = jnp.max(la, axis=0, keepdims=True)
    sh = la - ma
    logp = sh - jnp.log(jnp.sum(jnp.exp(sh), axis=0, keepdims=True))    # (C, TB)
    logp = jnp.where(valid, logp, 0.0)

    # onehot^T already in (C, TB); values are exact 0/1 even for garbage tail
    # targets, and the masked probs_m/logp zero those contributions anyway.
    onehot_t = (row_ids == trow).astype(jnp.float32)                    # (C, TB)

    # Contract over the lane (batch) axis of both operands:
    #   acc[c1, c2] += sum_b onehot_t[c1, b] * probs_m[c2, b]
    dn = (((1,), (1,)), ((), ()))
    acc_ref[...] += lax.dot_general(onehot_t, probs_m, dn,
                                    preferred_element_type=jnp.float32)
    g_ref[...] += lax.dot_general(onehot_t, logp, dn,
                                  preferred_element_type=jnp.float32)


# ----------------------------------------------------------------------------
# Row-major kernel (large C): tiles are (TB, C); lanes = classes (dense).
# ----------------------------------------------------------------------------
def _osl2_rmajor_kernel(lc_ref, la_ref, tcol_ref, trow_ref, acc_ref, g_ref, *,
                        n_valid, tile_b):
    TB, C = lc_ref.shape
    step = pl.program_id(0)

    @pl.when(step == 0)
    def _init():
        acc_ref[...] = jnp.zeros_like(acc_ref)
        g_ref[...] = jnp.zeros_like(g_ref)

    lc = lc_ref[...].astype(jnp.float32)               # (TB, C)
    la = la_ref[...].astype(jnp.float32)               # (TB, C)
    tcol = tcol_ref[...]                               # (TB, 1) int32
    trow = trow_ref[...]                               # (1, TB) int32
    # TODO(synk): derive tcol from trow in-kernel (small XLU transpose) to drop
    # the lane-padded (TB,1) stream; kept for lowering robustness on this path.

    row = lax.broadcasted_iota(jnp.int32, (TB, 1), 0)
    valid = (step * tile_b + row) < n_valid            # (TB, 1) bool

    m = jnp.max(lc, axis=-1, keepdims=True)                             # (TB, 1)
    col_ids = lax.broadcasted_iota(jnp.int32, (TB, C), 1)
    argmax = jnp.min(jnp.where(lc == m, col_ids, C), axis=-1, keepdims=True)
    correct = (argmax == tcol).astype(jnp.float32)                      # (TB, 1)

    e = jnp.exp(lc - m)
    denom = jnp.sum(e, axis=-1, keepdims=True)
    scale = correct * pl.reciprocal(denom, approx=False)                # (TB, 1)
    probs_m = jnp.where(valid, e * scale, 0.0)                          # (TB, C)

    ma = jnp.max(la, axis=-1, keepdims=True)
    sh = la - ma
    logp = sh - jnp.log(jnp.sum(jnp.exp(sh), axis=-1, keepdims=True))   # (TB, C)
    logp = jnp.where(valid, logp, 0.0)

    crow = lax.broadcasted_iota(jnp.int32, (C, TB), 0)
    onehot_t = (crow == trow).astype(jnp.float32)                       # (C, TB)

    acc_ref[...] += jnp.dot(onehot_t, probs_m, preferred_element_type=jnp.float32)
    g_ref[...] += jnp.dot(onehot_t, logp, preferred_element_type=jnp.float32)


# ----------------------------------------------------------------------------
# Wrappers
# ----------------------------------------------------------------------------
def _call_class_major(logits_clean, logits_adv, target, max_tile_b, budget):
    B, C = logits_clean.shape
    itemsize = jnp.dtype(logits_clean.dtype).itemsize
    sub = 32 // itemsize                        # sublane granularity (8 f32, 16 bf16)
    c_pad = _round_up(C, sub)
    # double-buffered VMEM per batch column: 2 logit streams + the target row
    per_col = 4 * c_pad * itemsize + 2 * 8 * 4
    fixed = 4 * _round_up(C, 8) * _round_up(C, 128) * 4     # acc/G blocks (x2 safety)
    cap = max_tile_b if max_tile_b is not None else 8192
    tb = max(min(cap, (budget - fixed) // per_col), 128)
    tb = (tb // 128) * 128
    if B <= tb:
        tb = B                                  # single tile: block == full dims
    num_tiles = pl.cdiv(B, tb)

    lc_t = logits_clean.T                       # (C, B): contiguous per-class DMA rows
    la_t = logits_adv.T
    trow = target.reshape(1, B)

    kernel = functools.partial(_osl2_cmajor_kernel, n_valid=B, tile_b=tb)
    return pl.pallas_call(
        kernel,
        out_shape=(jax.ShapeDtypeStruct((C, C), jnp.float32),
                   jax.ShapeDtypeStruct((C, C), jnp.float32)),
        grid_spec=pltpu.PrefetchScalarGridSpec(
            num_scalar_prefetch=0,
            grid=(num_tiles,),
            in_specs=[
                pl.BlockSpec((C, tb), lambda i: (0, i)),   # logits_clean^T tile
                pl.BlockSpec((C, tb), lambda i: (0, i)),   # logits_adv^T tile
                pl.BlockSpec((1, tb), lambda i: (0, i)),   # target row
            ],
            out_specs=[
                pl.BlockSpec((C, C), lambda i: (0, 0)),    # acc (resident accumulator)
                pl.BlockSpec((C, C), lambda i: (0, 0)),    # G   (resident accumulator)
            ],
        ),
        compiler_params=pltpu.CompilerParams(
            dimension_semantics=("arbitrary",),            # carried reduction over B
            vmem_limit_bytes=budget,
        ),
        cost_estimate=pl.CostEstimate(
            flops=4 * B * C * C,
            transcendentals=2 * B * C,
            bytes_accessed=2 * B * C * itemsize + 4 * B + 8 * C * C),
    )(lc_t, la_t, trow)


def _call_row_major(logits_clean, logits_adv, target, max_tile_b, budget):
    B, C = logits_clean.shape
    itemsize = jnp.dtype(logits_clean.dtype).itemsize
    c_lane = _round_up(C, 128)
    per_row = 4 * c_lane * itemsize + 2 * 128 * 4 + 2 * 8 * 4
    fixed = 4 * _round_up(C, 8) * c_lane * 4               # acc/G blocks (x2 safety)
    assert fixed + 128 * per_row <= budget, (
        "num_classes too large for resident (C, C) accumulators in VMEM")
    cap = max_tile_b if max_tile_b is not None else 4096
    tb = max(min(cap, (budget - fixed) // per_row), 128)
    tb = (tb // 128) * 128
    if B <= tb:
        tb = B
    num_tiles = pl.cdiv(B, tb)

    tcol = target.reshape(B, 1)
    trow = target.reshape(1, B)

    kernel = functools.partial(_osl2_rmajor_kernel, n_valid=B, tile_b=tb)
    return pl.pallas_call(
        kernel,
        out_shape=(jax.ShapeDtypeStruct((C, C), jnp.float32),
                   jax.ShapeDtypeStruct((C, C), jnp.float32)),
        grid_spec=pltpu.PrefetchScalarGridSpec(
            num_scalar_prefetch=0,
            grid=(num_tiles,),
            in_specs=[
                pl.BlockSpec((tb, C), lambda i: (i, 0)),   # logits_clean tile
                pl.BlockSpec((tb, C), lambda i: (i, 0)),   # logits_adv tile
                pl.BlockSpec((tb, 1), lambda i: (i, 0)),   # target column
                pl.BlockSpec((1, tb), lambda i: (0, i)),   # target row
            ],
            out_specs=[
                pl.BlockSpec((C, C), lambda i: (0, 0)),
                pl.BlockSpec((C, C), lambda i: (0, 0)),
            ],
        ),
        compiler_params=pltpu.CompilerParams(
            dimension_semantics=("arbitrary",),
            vmem_limit_bytes=budget,
        ),
        cost_estimate=pl.CostEstimate(
            flops=4 * B * C * C,
            transcendentals=2 * B * C,
            bytes_accessed=2 * B * C * itemsize + 8 * B + 8 * C * C),
    )(logits_clean, logits_adv, tcol, trow)


def _osl2_finalize(acc, g, n_valid):
    """Matrix build + loss (O(C^2), plain JAX)."""
    C = acc.shape[0]
    # rowsum(acc) == per-class correct count (softmax rows sum to 1), and
    # rowsum == 0 exactly iff count == 0, so the reference's two-step division
    # folds into a single normalization with the same diagonal fixup.
    norm = jnp.sum(acc, axis=-1, keepdims=True)
    has = norm > 0.0
    matrix = jnp.where(has, acc / jnp.where(has, norm, 1.0), 0.0)
    matrix = jnp.where(jnp.eye(C, dtype=bool) & jnp.logical_not(has), 1.0, matrix)
    # loss = mean_b sum_c -softlabel*logp = -sum(matrix ⊙ G) / B
    return -jnp.sum(matrix * g) / jnp.float32(n_valid)


def osl2_loss(logits_clean, logits_adv, target, *, max_tile_b=None,
              class_major_max_c=128):
    """Pallas implementation of OSL2.forward. Returns a scalar float32 loss.

    logits_* may be f32 or bf16 (cast to f32 inside the kernel); target is an
    integer vector of shape (B,).
    """
    B, C = logits_clean.shape
    assert logits_adv.shape == (B, C)
    target = target.reshape(B).astype(jnp.int32)
    budget = _vmem_budget_bytes()

    if C <= class_major_max_c:
        acc, g = _call_class_major(logits_clean, logits_adv, target,
                                   max_tile_b, budget)
    else:
        acc, g = _call_row_major(logits_clean, logits_adv, target,
                                 max_tile_b, budget)
    return _osl2_finalize(acc, g, B)


def _osl2_reference(logits_clean, logits_adv, target):
    """Plain-JAX reference mirroring the PyTorch module (two-step division)."""
    B, C = logits_clean.shape
    probs = jax.nn.softmax(logits_clean, axis=1)
    pred = jnp.argmax(logits_clean, axis=1)          # == argsort(probs)[:, 0]
    correct = (pred == target).astype(jnp.float32)
    acc = jax.ops.segment_sum(probs * correct[:, None], target, num_segments=C)
    count = jax.ops.segment_sum(correct, target, num_segments=C)[:, None]
    acc = jnp.where(count > 0, acc / jnp.where(count > 0, count, 1.0), acc)
    norm = jnp.sum(acc, axis=1, keepdims=True)
    matrix = jnp.where(norm > 0, acc / jnp.where(norm > 0, norm, 1.0), 0.0)
    matrix = jnp.where(jnp.eye(C, dtype=bool) & (count == 0), 1.0, matrix)
    logp = jax.nn.log_softmax(logits_adv, axis=-1)
    softlabel = matrix[target]
    return jnp.mean(jnp.sum(-softlabel * logp, axis=-1))


if __name__ == "__main__":
    root = jax.random.PRNGKey(0)
    k_small, k_big, k_wide = jax.random.split(root, 3)

    def make(B, num_classes, key):
        k1, k2, k3 = jax.random.split(key, 3)
        lc = jax.random.normal(k1, (B, num_classes), dtype=jnp.float32) * 3.0
        la = jax.random.normal(k2, (B, num_classes), dtype=jnp.float32) * 3.0
        tg = jax.random.randint(k3, (B,), 0, num_classes, dtype=jnp.int32)
        return lc, la, tg

    # small batch, module default C=10: class-major path, single tile
    lc, la, tg = make(8, 10, k_small)
    loss = osl2_loss(lc, la, tg)
    jax.block_until_ready(loss)
    ref = _osl2_reference(lc, la, tg)
    assert jnp.isfinite(loss), "loss is not finite"
    assert jnp.allclose(loss, ref, rtol=1e-5, atol=1e-5), (loss, ref)

    # larger ragged batch: multi-tile streamed reduction + in-kernel tail mask
    lc, la, tg = make(600, 10, k_big)
    loss = osl2_loss(lc, la, tg, max_tile_b=256)
    jax.block_until_ready(loss)
    ref = _osl2_reference(lc, la, tg)
    assert jnp.isfinite(loss), "loss is not finite"
    assert jnp.allclose(loss, ref, rtol=1e-5, atol=1e-5), (loss, ref)

    # wide-class case: exercises the row-major (large-C) path + diag fixup
    lc, la, tg = make(40, 256, k_wide)
    loss = osl2_loss(lc, la, tg)
    jax.block_until_ready(loss)
    ref = _osl2_reference(lc, la, tg)
    assert jnp.isfinite(loss), "loss is not finite"
    assert jnp.allclose(loss, ref, rtol=1e-5, atol=1e-5), (loss, ref)

    print("KERNEL_OK")
</pallas_src>

<mosaic_0001>
module attributes {stable_mosaic.version = 11 : i64} {
  func.func @_osl2_cmajor_kernel(%arg0: i32, %arg1: memref<10x8xf32, #tpu.memory_space<vmem>>, %arg2: memref<10x8xf32, #tpu.memory_space<vmem>>, %arg3: memref<1x8xi32, #tpu.memory_space<vmem>>, %arg4: memref<10x10xf32, #tpu.memory_space<vmem>>, %arg5: memref<10x10xf32, #tpu.memory_space<vmem>>) attributes {dimension_semantics = [#tpu.dimension_semantics<arbitrary>], iteration_bounds = array<i64: 1>, scalar_prefetch = 0 : i64, scratch_operands = 0 : i64, tpu.core_type = #tpu.core_type<tc>, window_params = [{transform_indices = @transform_0, window_bounds = array<i64: 10, 8>}, {transform_indices = @transform_1, window_bounds = array<i64: 10, 8>}, {transform_indices = @transform_2, window_bounds = array<i64: 1, 8>}, {pipeline_mode = #tpu.pipeline_mode<synchronous>, transform_indices = @transform_3, window_bounds = array<i64: 10, 10>}, {pipeline_mode = #tpu.pipeline_mode<synchronous>, transform_indices = @transform_4, window_bounds = array<i64: 10, 10>}]} {
    %c0_i32 = arith.constant 0 : i32
    %0 = arith.cmpi eq, %arg0, %c0_i32 : i32
    %1 = arith.extui %0 : i1 to i32
    %c0_i32_0 = arith.constant 0 : i32
    %2 = arith.cmpi ne, %1, %c0_i32_0 : i32
    scf.if %2 {
      %cst_23 = arith.constant 0.000000e+00 : f32
      %63 = vector.broadcast %cst_23 : f32 to vector<10x10xf32>
      %c0_24 = arith.constant 0 : index
      %c0_25 = arith.constant 0 : index
      %64 = vector.load %arg4[%c0_24, %c0_25] : memref<10x10xf32, #tpu.memory_space<vmem>>, vector<10x10xf32>
      tpu.vector_store %arg4[%c0_24, %c0_25], %63 {strides = array<i32>} : memref<10x10xf32, #tpu.memory_space<vmem>>, vector<10x10xf32>,
      %cst_26 = arith.constant 0.000000e+00 : f32
      %65 = vector.broadcast %cst_26 : f32 to vector<10x10xf32>
      %c0_27 = arith.constant 0 : index
      %c0_28 = arith.constant 0 : index
      %66 = vector.load %arg5[%c0_27, %c0_28] : memref<10x10xf32, #tpu.memory_space<vmem>>, vector<10x10xf32>
      tpu.vector_store %arg5[%c0_27, %c0_28], %65 {strides = array<i32>} : memref<10x10xf32, #tpu.memory_space<vmem>>, vector<10x10xf32>,
    } else {
    }
    %c0 = arith.constant 0 : index
    %c0_1 = arith.constant 0 : index
    %3 = vector.load %arg1[%c0, %c0_1] : memref<10x8xf32, #tpu.memory_space<vmem>>, vector<10x8xf32>
    %c0_2 = arith.constant 0 : index
    %c0_3 = arith.constant 0 : index
    %4 = vector.load %arg2[%c0_2, %c0_3] : memref<10x8xf32, #tpu.memory_space<vmem>>, vector<10x8xf32>
    %c0_4 = arith.constant 0 : index
    %c0_5 = arith.constant 0 : index
    %5 = vector.load %arg3[%c0_4, %c0_5] : memref<1x8xi32, #tpu.memory_space<vmem>>, vector<1x8xi32>
    %6 = tpu.iota {dimensions = array<i32: 1>} : vector<1x8xi32>
    %c8_i32 = arith.constant 8 : i32
    %7 = arith.muli %arg0, %c8_i32 : i32
    %8 = vector.broadcast %7 : i32 to vector<1x8xi32>
    %9 = arith.addi %8, %6 : vector<1x8xi32>
    %c8_i32_6 = arith.constant 8 : i32
    %10 = vector.broadcast %c8_i32_6 : i32 to vector<1x8xi32>
    %11 = arith.cmpi slt, %9, %10 : vector<1x8xi32>
    %cst = arith.constant dense<0xFF800000> : vector<8xf32>
    %12 = vector.multi_reduction <maximumf>, %3, %cst [0] : vector<10x8xf32> to vector<8xf32>
    %13 = vector.shape_cast %12 : vector<8xf32> to vector<1x8xf32>
    %14 = tpu.iota {dimensions = array<i32: 0>} : vector<10x8xi32>
    %15 = vector.broadcast %13 : vector<1x8xf32> to vector<10x8xf32>
    %16 = arith.cmpf oeq, %3, %15 : vector<10x8xf32>
    %c10_i32 = arith.constant 10 : i32
    %17 = vector.broadcast %c10_i32 : i32 to vector<10x8xi32>
    %18 = arith.select %16, %14, %17 : vector<10x8xi1>, vector<10x8xi32>
    %cst_7 = arith.constant dense<2147483647> : vector<8xi32>
    %19 = vector.multi_reduction <minsi>, %18, %cst_7 [0] : vector<10x8xi32> to vector<8xi32>
    %20 = vector.shape_cast %19 : vector<8xi32> to vector<1x8xi32>
    %21 = arith.cmpi eq, %20, %5 : vector<1x8xi32>
    %22 = arith.extui %21 : vector<1x8xi1> to vector<1x8xi32>
    %23 = arith.sitofp %22 : vector<1x8xi32> to vector<1x8xf32>
    %24 = vector.broadcast %13 : vector<1x8xf32> to vector<10x8xf32>
    %25 = arith.subf %3, %24 : vector<10x8xf32>
    %26 = math.exp %25 : vector<10x8xf32>
    %cst_8 = arith.constant dense<0.000000e+00> : vector<8xf32>
    %27 = vector.multi_reduction <add>, %26, %cst_8 [0] : vector<10x8xf32> to vector<8xf32>
    %28 = vector.shape_cast %27 : vector<8xf32> to vector<1x8xf32>
    %29 = tpu.reciprocal %28 : vector<1x8xf32> -> vector<1x8xf32>
    %30 = arith.mulf %23, %29 : vector<1x8xf32>
    %31 = vector.broadcast %30 : vector<1x8xf32> to vector<10x8xf32>
    %32 = arith.mulf %26, %31 : vector<10x8xf32>
    %cst_9 = arith.constant 0.000000e+00 : f32
    %33 = vector.shape_cast %11 : vector<1x8xi1> to vector<1x8xi1>
    %34 = vector.broadcast %33 : vector<1x8xi1> to vector<10x8xi1>
    %35 = vector.broadcast %cst_9 : f32 to vector<10x8xf32>
    %36 = arith.select %34, %32, %35 : vector<10x8xi1>, vector<10x8xf32>
    %cst_10 = arith.constant dense<0xFF800000> : vector<8xf32>
    %37 = vector.multi_reduction <maximumf>, %4, %cst_10 [0] : vector<10x8xf32> to vector<8xf32>
    %38 = vector.shape_cast %37 : vector<8xf32> to vector<1x8xf32>
    %39 = vector.broadcast %38 : vector<1x8xf32> to vector<10x8xf32>
    %40 = arith.subf %4, %39 : vector<10x8xf32>
    %41 = math.exp %40 : vector<10x8xf32>
    %cst_11 = arith.constant dense<0.000000e+00> : vector<8xf32>
    %42 = vector.multi_reduction <add>, %41, %cst_11 [0] : vector<10x8xf32> to vector<8xf32>
    %43 = vector.shape_cast %42 : vector<8xf32> to vector<1x8xf32>
    %44 = math.log %43 : vector<1x8xf32>
    %45 = vector.broadcast %44 : vector<1x8xf32> to vector<10x8xf32>
    %46 = arith.subf %40, %45 : vector<10x8xf32>
    %cst_12 = arith.constant 0.000000e+00 : f32
    %47 = vector.shape_cast %11 : vector<1x8xi1> to vector<1x8xi1>
    %48 = vector.broadcast %47 : vector<1x8xi1> to vector<10x8xi1>
    %49 = vector.broadcast %cst_12 : f32 to vector<10x8xf32>
    %50 = arith.select %48, %46, %49 : vector<10x8xi1>, vector<10x8xf32>
    %51 = vector.broadcast %5 : vector<1x8xi32> to vector<10x8xi32>
    %52 = arith.cmpi eq, %14, %51 : vector<10x8xi32>
    %53 = arith.extui %52 : vector<10x8xi1> to vector<10x8xi32>
    %54 = arith.sitofp %53 : vector<10x8xi32> to vector<10x8xf32>
    %c0_13 = arith.constant 0 : index
    %c0_14 = arith.constant 0 : index
    %55 = vector.load %arg4[%c0_13, %c0_14] : memref<10x10xf32, #tpu.memory_space<vmem>>, vector<10x10xf32>
    %cst_15 = arith.constant dense<0.000000e+00> : vector<10x10xf32>
    %56 = tpu.matmul %54, %36, %cst_15 {dimension_numbers = #tpu.dot_dimension_numbers<[1], [1], [0], [0], [0, 0, 1, 0], [], []>} : vector<10x8xf32>, vector<10x8xf32>, vector<10x10xf32> -> vector<10x10xf32>
    %57 = arith.addf %55, %56 : vector<10x10xf32>
    %c0_16 = arith.constant 0 : index
    %c0_17 = arith.constant 0 : index
    %58 = vector.load %arg4[%c0_16, %c0_17] : memref<10x10xf32, #tpu.memory_space<vmem>>, vector<10x10xf32>
    tpu.vector_store %arg4[%c0_16, %c0_17], %57 {strides = array<i32>} : memref<10x10xf32, #tpu.memory_space<vmem>>, vector<10x10xf32>,
    %c0_18 = arith.constant 0 : index
    %c0_19 = arith.constant 0 : index
    %59 = vector.load %arg5[%c0_18, %c0_19] : memref<10x10xf32, #tpu.memory_space<vmem>>, vector<10x10xf32>
    %cst_20 = arith.constant dense<0.000000e+00> : vector<10x10xf32>
    %60 = tpu.matmul %54, %50, %cst_20 {dimension_numbers = #tpu.dot_dimension_numbers<[1], [1], [0], [0], [0, 0, 1, 0], [], []>} : vector<10x8xf32>, vector<10x8xf32>, vector<10x10xf32> -> vector<10x10xf32>
    %61 = arith.addf %59, %60 : vector<10x10xf32>
    %c0_21 = arith.constant 0 : index
    %c0_22 = arith.constant 0 : index
    %62 = vector.load %arg5[%c0_21, %c0_22] : memref<10x10xf32, #tpu.memory_space<vmem>>, vector<10x10xf32>
    tpu.vector_store %arg5[%c0_21, %c0_22], %61 {strides = array<i32>} : memref<10x10xf32, #tpu.memory_space<vmem>>, vector<10x10xf32>,
    return
  }
  func.func @transform_0(%arg0: i32) -> (i32, i32) {
    %c0_i32 = arith.constant 0 : i32
    %c0_i32_0 = arith.constant 0 : i32
    return %c0_i32, %arg0 : i32, i32
  }
  func.func @transform_1(%arg0: i32) -> (i32, i32) {
    %c0_i32 = arith.constant 0 : i32
    %c0_i32_0 = arith.constant 0 : i32
    return %c0_i32, %arg0 : i32, i32
  }
  func.func @transform_2(%arg0: i32) -> (i32, i32) {
    %c0_i32 = arith.constant 0 : i32
    %c0_i32_0 = arith.constant 0 : i32
    return %c0_i32, %arg0 : i32, i32
  }
  func.func @transform_3(%arg0: i32) -> (i32, i32) {
    %c0_i32 = arith.constant 0 : i32
    %c0_i32_0 = arith.constant 0 : i32
    %c0_i32_1 = arith.constant 0 : i32
    return %c0_i32, %c0_i32_0 : i32, i32
  }
  func.func @transform_4(%arg0: i32) -> (i32, i32) {
    %c0_i32 = arith.constant 0 : i32
    %c0_i32_0 = arith.constant 0 : i32
    %c0_i32_1 = arith.constant 0 : i32
    return %c0_i32, %c0_i32_0 : i32, i32
  }
}

</mosaic_0001>

<bundles_post_ra>
// kernel: tpu_custom_call.1
= control target key start
LH: loop header
LB: loop body
LE: loop exit
PB: predicated region body
PF: predicated region fallthrough
CT: control target
= control target key end

     0   :  { %10 = vsyncpa [#allocation3], 0  ;;  %v33_v3 = vlaneseq  ;;  %vm39_vm0 = vcmask 64512   ;;  %vm41_vm1 = vcmask 58368   ;;  %vm24_vm2 = vcmask 74752   ;;  %s560_s0 = inlined_call_operand.vmem [shape: f32[10,8], index: 0, kind: input, shape index: {}]   ;;  %s561_s1 = inlined_call_operand.vmem [shape: f32[10,8], index: 1, kind: input, shape index: {}]   ;;  %s562_s2 = inlined_call_operand.vmem [shape: s32[1,8], index: 2, kind: input, shape index: {}]   ;;  %s563_s3 = inlined_call_operand.hbm [shape: f32[10,10], index: 3, kind: output, shape index: {0}]   ;;  %s564_s4 = inlined_call_operand.hbm [shape: f32[10,10], index: 4, kind: output, shape index: {1}]  }
   0x1   :  { %v28_v0 = vld [vmem:[%s560_s0] sm:$0xff]  ;;  %v29_v1 = vld [vmem:[%s560_s0 + $0x8] sm:$0x3] }
   0x2   :  { %v30_v2 = vld [vmem:[%s561_s1] sm:$0xff]  ;;  %v31_v4 = vld [vmem:[%s561_s1 + $0x8] sm:$0x3]  ;;  %v40_v5 = vsel %vm39_vm0, %v28_v0, -inf  ;;  %v42_v6 = vsel %vm41_vm1, %v29_v1, -inf  ;;  %v494_v9 = vshrl.u32 %v33_v3, 7 }
   0x3   :  { %v100_v7 = vsel %vm39_vm0, %v30_v2, -inf  ;;  %v43_v8 = vmax.f32 %v40_v5, %v42_v6  ;;  %v101_v10 = vsel %vm41_vm1, %v31_v4, -inf }
   0x4   :  { %v102_v11 = vmax.f32 %v100_v7, %v101_v10 }
   0x5   :  { %11 = vsyncpa [#allocation5], 0  ;;  %v44_v12 = vrot.slane %v43_v8, 4  ;;  %v92_v13 = vsub.s32 0, %v494_v9  ;;  %v448_v14 = vmov 0.0   ;;  %v518_v28 = vadd.s32 8, %v494_v9 }
   0x6   :  { %27 = vst.msk [vmem:[#allocation4 + $0x8] sm:$0x3] %vm24_vm2, %v448_v14  ;;  %25 = vst.msk [vmem:[#allocation2 + $0x8] sm:$0x3] %vm24_vm2, %v448_v14  ;;  %v103_v15 = vrot.slane %v102_v11, 4  ;;  %vm22_vm13 = vcmask 80896  }
   0x7   :  { %v505_v16 = vld [vmem:[%s562_s2] sm:$0x1]  ;;  %v45_v17 = vmax.f32 %v43_v8, %v44_v12  ;;  %v34_v8 = vand.u32 127, %v33_v3  ;;  %26 = vst.msk [vmem:[#allocation4] sm:$0xff] %vm22_vm13, %v448_v14  ;;  %23 = vst.msk [vmem:[#allocation2] sm:$0xff] %vm22_vm13, %v448_v14  ;;  %s449_s2 = smov [#allocation4]  }
   0x8   :  { %v510_v18 = vrot.slane %v505_v16, %v92_v13  ;;  %v104_v19 = vmax.f32 %v102_v11, %v103_v15  ;;  %s339_s23 = sshll.u32 %s449_s2, 4  ;;  %s450_s24 = smov [#allocation2]   ;;  %s340_s23 = int_to_ptr.vmem [resolvable:$true] %s339_s23 }
   0x9   :  { %v46_v20 = vrot.slane %v45_v17, 2  ;;  %vm38_vm11 = vcmp.lt.s32.totalorder %v34_v8, 8  ;;  %s327_s25 = sshll.u32 %s450_s24, 4  ;;  %s404_s26 = scalar_lea.vmem %s340_s23, 256  ;;  %s328_s25 = int_to_ptr.vmem [resolvable:$true] %s327_s25 }
   0xa   :  { %vm134_vm3 = vcmp.eq.s32.totalorder %v494_v9, %v510_v18  ;;  %v105_v21 = vrot.slane %v104_v19, 2  ;;  %vm135_vm12 = vcmp.eq.s32.totalorder %v518_v28, %v510_v18  ;;  %p405_p0 = scmp.ne.s32.totalorder %s340_s23, %s404_s26  ;;  %p409_p1 = scmp.lt.s32.totalorder %s340_s23, %s340_s23 }
   0xb   :  { %v355_v22 = vsel %vm134_vm3, 1.0, %v448_v14  ;;  %v47_v23 = vmax.f32 %v45_v17, %v46_v20  ;;  %p410_p2 = scmp.lt.s32.totalorder %s404_s26, %s404_s26 }
   0xc   :  { %384 = vmatprep.mubr.msk.f32.mxu1 %vm39_vm0, %v355_v22  ;;  %377 = vmatprep.mubr.msk.f32.mxu0 %vm39_vm0, %v355_v22  ;;  %v106_v24 = vmax.f32 %v104_v19, %v105_v21 }
   0xd   :  { %v48_v25 = vrot.slane %v47_v23, 1  ;;  %p411_p3 = por %p410_p2, %p409_p1 }
   0xe   :  { %v107_v26 = vrot.slane %v106_v24, 1 }
   0xf   :  { %v49_v27 = vmax.f32 %v47_v23, %v48_v25  ;;  %p412_p4 = pnand %p411_p3, %p405_p0 }
  0x10   :  { %v108_v29 = vmax.f32 %v106_v24, %v107_v26  ;;  %v235_v26 = vld [vmem:[#allocation4] sm:$0xff] }
  0x11   :  { %vm53_vm4 = vcmp.eq.f32.partialorder %v28_v0, %v49_v27  ;;  %vm54_vm5 = vcmp.eq.f32.partialorder %v29_v1, %v49_v27  ;;  %v73_v30 = vsub.f32 %v28_v0, %v49_v27  ;;  %v74_v31 = vsub.f32 %v29_v1, %v49_v27 }
  0x12   :  { %v109_v32 = vsub.f32 %v30_v2, %v108_v29  ;;  %v110_v33 = vsub.f32 %v31_v4, %v108_v29  ;;  %v55_v34 = vsel %vm53_vm4, %v494_v9, 10  ;;  %v56_v35 = vsel %vm54_vm5, %v518_v28, 10  ;;  %v141_v28 = vld [vmem:[#allocation2 + $0x8] sm:$0x3] }
  0x13   :  { %v75_v36 = vmul.f32 1.442695, %v73_v30  ;;  %v77_v39 = vmul.f32 1.442695, %v74_v31  ;;  %v57_v40 = vsel %vm39_vm0, %v55_v34, 2147483647 }
  0x14   :  { %v111_v37 = vmul.f32 1.442695, %v109_v32  ;;  %v113_v38 = vmul.f32 1.442695, %v110_v33  ;;  %v58_v41 = vsel %vm41_vm1, %v56_v35, 2147483647 }
  0x15   :  { %392 = vpow2.f32 %v75_v36  ;;  %vm59_vm6 = vcmp.lt.s32.totalorder %v57_v40, %v58_v41  ;;  %v356_v9 = vsel %vm135_vm12, 1.0, %v448_v14 }
  0x16   :  { %394 = vpow2.f32 %v111_v37  ;;  %v60_v42 = vsel %vm59_vm6, %v57_v40, %v58_v41 }
  0x17   :  { %396 = vpow2.f32 %v113_v38  ;;  %v61_v43 = vrot.slane %v60_v42, 4 }
  0x18   :  { %398 = vpow2.f32 %v77_v39 }
  0x19   :  { %vm62_vm7 = vcmp.lt.s32.totalorder %v60_v42, %v61_v43 }
  0x1a   :  { %v63_v52 = vsel %vm62_vm7, %v60_v42, %v61_v43 }
  0x1b   :  { %v64_v56 = vrot.slane %v63_v52, 2 }
  0x1d   :  { %vm65_vm8 = vcmp.lt.s32.totalorder %v63_v52, %v64_v56 }
  0x1e   :  { %v66_v1 = vsel %vm65_vm8, %v63_v52, %v64_v56 }
  0x1f   :  { %v67_v5 = vrot.slane %v66_v1, 1 }
  0x21   :  { %vm68_vm9 = vcmp.lt.s32.totalorder %v66_v1, %v67_v5 }
  0x22   :  { %v393_v44 = vpop.eup %392  ;;  %v69_v7 = vsel %vm68_vm9, %v66_v1, %v67_v5 }
  0x23   :  { %v395_v45 = vpop.eup %394  ;;  %v79_v48 = vsel %vm39_vm0, %v393_v44, 0.0  ;;  %vm70_vm10 = vcmp.eq.s32.totalorder %v69_v7, %v505_v16 }
  0x24   :  { %v397_v46 = vpop.eup %396  ;;  %v115_v47 = vsel %vm39_vm0, %v395_v45, 0.0  ;;  %v354_v10 = vsel %vm70_vm10, 1.0, %v448_v14 }
  0x25   :  { %v399_v49 = vpop.eup %398  ;;  %v116_v50 = vsel %vm41_vm1, %v397_v46, 0.0 }
  0x26   :  { %v117_v51 = vadd.f32 %v116_v50, %v115_v47  ;;  %v80_v53 = vsel %vm41_vm1, %v399_v49, 0.0 }
  0x27   :  { %v81_v54 = vadd.f32 %v80_v53, %v79_v48 }
  0x28   :  { %v118_v55 = vrot.slane %v117_v51, 4 }
  0x29   :  { %v82_v57 = vrot.slane %v81_v54, 4 }
  0x2a   :  { %v119_v58 = vadd.f32 %v118_v55, %v117_v51 }
  0x2b   :  { %v83_v59 = vadd.f32 %v82_v57, %v81_v54 }
  0x2c   :  { %v120_v60 = vrot.slane %v119_v58, 2 }
  0x2d   :  { %v84_v61 = vrot.slane %v83_v59, 2 }
  0x2e   :  { %v121_v62 = vadd.f32 %v120_v60, %v119_v58 }
  0x2f   :  { %v85_v63 = vadd.f32 %v84_v61, %v83_v59 }
  0x30   :  { %v122_v0 = vrot.slane %v121_v62, 1 }
  0x31   :  { %v86_v2 = vrot.slane %v85_v63, 1 }
  0x32   :  { %v123_v4 = vadd.f32 %v122_v0, %v121_v62 }
  0x33   :  { %v87_v6 = vadd.f32 %v86_v2, %v85_v63 }
  0x34   :  { %400 = vlog2.f32 %v123_v4 }
  0x35   :  { %402 = vrcp.f32 %v87_v6 }
  0x41   :  { %v401_v11 = vpop.eup %400 }
  0x42   :  { %v403_v12 = vpop.eup %402  ;;  %v125_v15 = vmul.f32 0.6931472, %v401_v11 }
  0x43   :  { %v89_v17 = vmul.f32 %v403_v12, %v354_v10 }
  0x44   :  { %v127_v19 = vsub.f32 %v110_v33, %v125_v15  ;;  %v126_v20 = vsub.f32 %v109_v32, %v125_v15  ;;  %v140_v32 = vld [vmem:[#allocation2] sm:$0xff] }
  0x45   :  { %v93_v21 = vrot.slane %v89_v17, %v92_v13  ;;  %v236_v13 = vld [vmem:[#allocation4 + $0x8] sm:$0x3] }
  0x46   :  { %v129_v22 = vsel %vm38_vm11, %v127_v19, 0.0  ;;  %v128_v23 = vsel %vm38_vm11, %v126_v20, 0.0 }
  0x47   :  { %380 = vmatprep.subr.msk.mxu1 %vm39_vm0, %v129_v22  ;;  %v95_v24 = vmul.f32 %v399_v49, %v93_v21  ;;  %v94_v16 = vmul.f32 %v393_v44, %v93_v21 }
  0x48   :  { %381 = vmatpush3.xpose.msk.msra.mxu1 %vm39_vm0, %v129_v22 }
  0x49   :  { %v99_v3 = vsel %vm38_vm11, %v95_v24, 0.0  ;;  %382 = vmatprep.subr.msk.mxu1 %vm39_vm0, %v128_v23  ;;  %v98_v25 = vsel %vm38_vm11, %v94_v16, 0.0 }
  0x4a   :  { %373 = vmatprep.subr.msk.mxu0 %vm39_vm0, %v99_v3 }
  0x4b   :  { %374 = vmatpush3.xpose.msk.msra.mxu0 %vm39_vm0, %v99_v3 }
  0x4c   :  { %383 = vmatpush3.xpose.msk.msra.mxu1 %vm39_vm0, %v128_v23  ;;  %375 = vmatprep.subr.msk.mxu0 %vm39_vm0, %v98_v25 }
  0x4f   :  { %376 = vmatpush3.xpose.msk.msra.mxu0 %vm39_vm0, %v98_v25  ;;  %385 = vmatmul.mubr.msk.f32.vlgmr.msra.gmra.mxu1 %vm39_vm0, %v356_v9 }
  0x52   :  { %378 = vmatmul.mubr.msk.f32.vlgmr.msra.gmra.mxu0 %vm39_vm0, %v356_v9 }
 0x10f   :  { %v386_v18 = vpop.f32.mrf.mxu1 }
 0x110   :  { %v319_v27 = vadd.f32 %v386_v18, %v236_v13 }
 0x111   :  { %v309_v29 = vpop.f32.mrf.mxu1 }
 0x112   :  { %321 = vst.msk [vmem:[#allocation4 + $0x8] sm:$0x3] %vm24_vm2, %v319_v27  ;;  %v379_v30 = vpop.f32.mrf.mxu0  ;;  %v318_v31 = vadd.f32 %v309_v29, %v235_v26 }
 0x113   :  { %v230_v33 = vadd.f32 %v379_v30, %v141_v28 }
 0x114   :  { %320 = vst.msk [vmem:[#allocation4] sm:$0xff] %vm22_vm13, %v318_v31  ;;  %v220_v14 = vpop.f32.mrf.mxu0 }
 0x115   :  { %234 = vst.msk [vmem:[#allocation2 + $0x8] sm:$0x3] %vm24_vm2, %v230_v33  ;;  %v229_v34 = vadd.f32 %v220_v14, %v140_v32 }
 0x116   :  { %415 = shalt.err (!%p412_p4)
}
 0x117   :  { %s451_s27 = smov 128   ;;  %s452_s28 = smov 8   ;;  %232 = vst.msk [vmem:[#allocation2] sm:$0xff] %vm22_vm13, %v229_v34 }
 0x118   :  { %345 = dma.vmem_to_hbm [thread:$0]  %s340_s23, 256, %s564_s4, [#allocation5], %s451_s27, %s451_s27, %s452_s28  }
 0x119   :  { %s424_s5 = scalar_lea.vmem %s328_s25, 256  ;;  %p429_p6 = scmp.lt.s32.totalorder %s328_s25, %s328_s25 }
 0x11a   :  { %p425_p5 = scmp.ne.s32.totalorder %s328_s25, %s424_s5  ;;  %p430_p7 = scmp.lt.s32.totalorder %s424_s5, %s424_s5 }
 0x11c   :  { %p431_p8 = por %p430_p7, %p429_p6 }
 0x11e   :  { %p432_p9 = pnand %p431_p8, %p425_p5 }
 0x120   :  { %435 = shalt.err (!%p432_p9)
}
 0x121   :  { %333 = dma.vmem_to_hbm [thread:$0]  %s328_s25, 256, %s563_s3, [#allocation3], %s451_s27, %s451_s27, %s452_s28  }
 0x122   :  { %444 = dma.done.wait [#allocation3], 256  }
 0x123   :  { %445 = vsyncadd [#allocation3], 4294967040 }
 0x124   :  { %446 = dma.done.wait [#allocation5], 256  }
 0x125   :  { %447 = vsyncadd [#allocation5], 4294967040 }
 0x126   :  { %352 = vsyncpa [#allocation3], 1 }
 0x127   :  { %353 = vsyncpa [#allocation5], 1 }

</bundles_post_ra>
